<compile_context>
chip_gen: v7x
topology: tpu7x:2x2x1
jax: 0.10.0
libtpu: 0.0.40
codegen_flags: <defaults>
</compile_context>

<pallas_src>
import jax
import jax.numpy as jnp
from jax.experimental import pallas as pl
from jax.experimental.pallas import tpu as pltpu


def audio_mlp_kernel(x_ref, w1_ref, b1_ref, w2_ref, b2_ref, o_ref):
    # Hoisted bias loads (read once per tile).
    b1 = b1_ref[...]
    b2 = b2_ref[...]
    # fc1 + ReLU
    h = jnp.dot(x_ref[...], w1_ref[...], preferred_element_type=jnp.float32)
    h = jnp.maximum(h + b1, 0.0)
    # TODO(synk): dropout is identity here (eval-mode semantics); training-mode
    # dropout would use pltpu.prng_seed + pltpu.prng_random_bits for the mask.
    # fc2
    y = jnp.dot(h, w2_ref[...], preferred_element_type=jnp.float32) + b2
    o_ref[...] = y.astype(o_ref.dtype)


def _round_up(x, m):
    return ((x + m - 1) // m) * m


def audio_model_forward(x, w1, b1, w2, b2, *, block_b=1024, k_pad=64):
    B, len_ip = x.shape
    inter_dim = w1.shape[1]
    orig_dtype = x.dtype

    # --- K padding: 42 -> 64 so the x tile / W1 feed are (8,128)-friendly. ---
    if len_ip < k_pad:
        x = jnp.pad(x, ((0, 0), (0, k_pad - len_ip)))
        w1 = jnp.pad(w1, ((0, k_pad - len_ip), (0, 0)))
    K = x.shape[1]

    # --- Batch tiling: large tiles, multiple of 8, not (much) bigger than B. ---
    block_b = max(8, min(block_b, _round_up(B, 8)))
    B_pad = _round_up(B, block_b)
    if B_pad != B:
        x = jnp.pad(x, ((0, B_pad - B), (0, 0)))
    num_blocks = B_pad // block_b

    out = pl.pallas_call(
        audio_mlp_kernel,
        out_shape=jax.ShapeDtypeStruct((B_pad, inter_dim), orig_dtype),
        grid_spec=pltpu.PrefetchScalarGridSpec(
            num_scalar_prefetch=0,
            grid=(num_blocks,),
            in_specs=[
                pl.BlockSpec((block_b, K), lambda i: (i, 0)),        # x tile
                pl.BlockSpec((K, inter_dim), lambda i: (0, 0)),      # W1 (resident)
                pl.BlockSpec((1, inter_dim), lambda i: (0, 0)),      # b1
                pl.BlockSpec((inter_dim, inter_dim), lambda i: (0, 0)),  # W2
                pl.BlockSpec((1, inter_dim), lambda i: (0, 0)),      # b2
            ],
            out_specs=pl.BlockSpec((block_b, inter_dim), lambda i: (i, 0)),
        ),
        compiler_params=pltpu.CompilerParams(
            dimension_semantics=("parallel",),     # lets v7x shard batch over 2 TCs
            vmem_limit_bytes=32 * 1024 * 1024,     # safe on v7x's smaller VMEM
        ),
    )(x, w1, b1, w2, b2)

    return out[:B]


def init_params(key, len_ip=42, inter_dim=32, dtype=jnp.float32):
    # Deterministic synthetic init (uniform, PyTorch-Linear-style bounds).
    k1, k2, k3, k4 = jax.random.split(key, 4)
    bound1 = 1.0 / jnp.sqrt(len_ip)
    bound2 = 1.0 / jnp.sqrt(inter_dim)
    # Stored already transposed: (in_features, out_features)
    w1 = jax.random.uniform(k1, (len_ip, inter_dim), dtype, -bound1, bound1)
    b1 = jax.random.uniform(k2, (1, inter_dim), dtype, -bound1, bound1)
    w2 = jax.random.uniform(k3, (inter_dim, inter_dim), dtype, -bound2, bound2)
    b2 = jax.random.uniform(k4, (1, inter_dim), dtype, -bound2, bound2)
    return w1, b1, w2, b2


def reference_forward(x, w1, b1, w2, b2):
    h = jnp.maximum(x @ w1 + b1, 0.0)
    return h @ w2 + b2


if __name__ == "__main__":
    key = jax.random.PRNGKey(0)
    kx1, kx2, kp = jax.random.split(key, 3)

    len_ip, inter_dim = 42, 32
    w1, b1, w2, b2 = init_params(kp, len_ip=len_ip, inter_dim=inter_dim)

    # Small single-tile case.
    B1 = 8
    x1 = jax.random.normal(kx1, (B1, len_ip), dtype=jnp.float32)
    out1 = jax.block_until_ready(audio_model_forward(x1, w1, b1, w2, b2))
    ref1 = reference_forward(x1, w1, b1, w2, b2)
    assert out1.shape == (B1, inter_dim)
    assert jnp.allclose(out1, ref1, atol=1e-5, rtol=1e-5)

    # Multi-tile case with a partial final batch (exercises grid > 1 + padding).
    B2 = 40
    x2 = jax.random.normal(kx2, (B2, len_ip), dtype=jnp.float32)
    out2 = jax.block_until_ready(
        audio_model_forward(x2, w1, b1, w2, b2, block_b=16))
    ref2 = reference_forward(x2, w1, b1, w2, b2)
    assert out2.shape == (B2, inter_dim)
    assert jnp.allclose(out2, ref2, atol=1e-5, rtol=1e-5)

    print("KERNEL_OK")
</pallas_src>

<mosaic_0001>
module attributes {stable_mosaic.version = 11 : i64} {
  func.func @audio_mlp_kernel(%arg0: i32, %arg1: memref<8x64xf32, #tpu.memory_space<vmem>>, %arg2: memref<64x32xf32, #tpu.memory_space<vmem>>, %arg3: memref<1x32xf32, #tpu.memory_space<vmem>>, %arg4: memref<32x32xf32, #tpu.memory_space<vmem>>, %arg5: memref<1x32xf32, #tpu.memory_space<vmem>>, %arg6: memref<8x32xf32, #tpu.memory_space<vmem>>) attributes {dimension_semantics = [#tpu.dimension_semantics<parallel>], iteration_bounds = array<i64: 1>, scalar_prefetch = 0 : i64, scratch_operands = 0 : i64, tpu.core_type = #tpu.core_type<tc>, window_params = [{transform_indices = @transform_0, window_bounds = array<i64: 8, 64>}, {pipeline_mode = #tpu.pipeline_mode<synchronous>, transform_indices = @transform_1, window_bounds = array<i64: 64, 32>}, {pipeline_mode = #tpu.pipeline_mode<synchronous>, transform_indices = @transform_2, window_bounds = array<i64: 1, 32>}, {pipeline_mode = #tpu.pipeline_mode<synchronous>, transform_indices = @transform_3, window_bounds = array<i64: 32, 32>}, {pipeline_mode = #tpu.pipeline_mode<synchronous>, transform_indices = @transform_4, window_bounds = array<i64: 1, 32>}, {transform_indices = @transform_5, window_bounds = array<i64: 8, 32>}]} {
    %c0 = arith.constant 0 : index
    %c0_0 = arith.constant 0 : index
    %0 = vector.load %arg3[%c0, %c0_0] : memref<1x32xf32, #tpu.memory_space<vmem>>, vector<1x32xf32>
    %c0_1 = arith.constant 0 : index
    %c0_2 = arith.constant 0 : index
    %1 = vector.load %arg5[%c0_1, %c0_2] : memref<1x32xf32, #tpu.memory_space<vmem>>, vector<1x32xf32>
    %c0_3 = arith.constant 0 : index
    %c0_4 = arith.constant 0 : index
    %2 = vector.load %arg1[%c0_3, %c0_4] : memref<8x64xf32, #tpu.memory_space<vmem>>, vector<8x64xf32>
    %c0_5 = arith.constant 0 : index
    %c0_6 = arith.constant 0 : index
    %3 = vector.load %arg2[%c0_5, %c0_6] : memref<64x32xf32, #tpu.memory_space<vmem>>, vector<64x32xf32>
    %cst = arith.constant dense<0.000000e+00> : vector<8x32xf32>
    %4 = tpu.matmul %2, %3, %cst {dimension_numbers = #tpu.dot_dimension_numbers<[1], [0], [0], [1], [0, 0, 1, 1], [], []>} : vector<8x64xf32>, vector<64x32xf32>, vector<8x32xf32> -> vector<8x32xf32>
    %5 = vector.broadcast %0 : vector<1x32xf32> to vector<8x32xf32>
    %6 = arith.addf %4, %5 : vector<8x32xf32>
    %cst_7 = arith.constant 0.000000e+00 : f32
    %7 = vector.broadcast %cst_7 : f32 to vector<8x32xf32>
    %8 = arith.maximumf %6, %7 : vector<8x32xf32>
    %c0_8 = arith.constant 0 : index
    %c0_9 = arith.constant 0 : index
    %9 = vector.load %arg4[%c0_8, %c0_9] : memref<32x32xf32, #tpu.memory_space<vmem>>, vector<32x32xf32>
    %cst_10 = arith.constant dense<0.000000e+00> : vector<8x32xf32>
    %10 = tpu.matmul %8, %9, %cst_10 {dimension_numbers = #tpu.dot_dimension_numbers<[1], [0], [0], [1], [0, 0, 1, 1], [], []>} : vector<8x32xf32>, vector<32x32xf32>, vector<8x32xf32> -> vector<8x32xf32>
    %11 = vector.broadcast %1 : vector<1x32xf32> to vector<8x32xf32>
    %12 = arith.addf %10, %11 : vector<8x32xf32>
    %c0_11 = arith.constant 0 : index
    %c0_12 = arith.constant 0 : index
    %13 = vector.load %arg6[%c0_11, %c0_12] : memref<8x32xf32, #tpu.memory_space<vmem>>, vector<8x32xf32>
    tpu.vector_store %arg6[%c0_11, %c0_12], %12 {strides = array<i32>} : memref<8x32xf32, #tpu.memory_space<vmem>>, vector<8x32xf32>,
    return
  }
  func.func @transform_0(%arg0: i32) -> (i32, i32) {
    %c0_i32 = arith.constant 0 : i32
    %c0_i32_0 = arith.constant 0 : i32
    return %arg0, %c0_i32 : i32, i32
  }
  func.func @transform_1(%arg0: i32) -> (i32, i32) {
    %c0_i32 = arith.constant 0 : i32
    %c0_i32_0 = arith.constant 0 : i32
    %c0_i32_1 = arith.constant 0 : i32
    return %c0_i32, %c0_i32_0 : i32, i32
  }
  func.func @transform_2(%arg0: i32) -> (i32, i32) {
    %c0_i32 = arith.constant 0 : i32
    %c0_i32_0 = arith.constant 0 : i32
    %c0_i32_1 = arith.constant 0 : i32
    return %c0_i32, %c0_i32_0 : i32, i32
  }
  func.func @transform_3(%arg0: i32) -> (i32, i32) {
    %c0_i32 = arith.constant 0 : i32
    %c0_i32_0 = arith.constant 0 : i32
    %c0_i32_1 = arith.constant 0 : i32
    return %c0_i32, %c0_i32_0 : i32, i32
  }
  func.func @transform_4(%arg0: i32) -> (i32, i32) {
    %c0_i32 = arith.constant 0 : i32
    %c0_i32_0 = arith.constant 0 : i32
    %c0_i32_1 = arith.constant 0 : i32
    return %c0_i32, %c0_i32_0 : i32, i32
  }
  func.func @transform_5(%arg0: i32) -> (i32, i32) {
    %c0_i32 = arith.constant 0 : i32
    %c0_i32_0 = arith.constant 0 : i32
    return %arg0, %c0_i32 : i32, i32
  }
}

</mosaic_0001>

<bundles_post_ra>
// kernel: tpu_custom_call.1
= control target key start
LH: loop header
LB: loop body
LE: loop exit
PB: predicated region body
PF: predicated region fallthrough
CT: control target
= control target key end

     0   :  { %v306_v3 = vmov 0.0|0.0   ;;  %vm307_vm0 = vmmov 0   ;;  %v308_v6 = vmov 0.0   ;;  %s397_s0 = inlined_call_operand.vmem [shape: f32[8,64], index: 0, kind: input, shape index: {}]   ;;  %s398_s1 = inlined_call_operand.vmem [shape: f32[64,32], index: 1, kind: input, shape index: {}]   ;;  %s399_s2 = inlined_call_operand.vmem [shape: f32[1,32], index: 2, kind: input, shape index: {}]   ;;  %s400_s3 = inlined_call_operand.vmem [shape: f32[32,32], index: 3, kind: input, shape index: {}]   ;;  %s401_s4 = inlined_call_operand.vmem [shape: f32[1,32], index: 4, kind: input, shape index: {}]   ;;  %s402_s5 = inlined_call_operand.hbm [shape: f32[8,32], index: 5, kind: output, shape index: {}]  }
   0x1   :  { %v24_v0 = vld [vmem:[%s398_s1] sm:$0xff]  ;;  %v25_v1 = vld [vmem:[%s398_s1 + $0x8] sm:$0xff]  ;;  %v26_v2 = vld [vmem:[%s398_s1 + $0x10] sm:$0xff]  ;;  %260 = vmatprep.subr.bf16.mxu0 %v306_v3  ;;  %246 = vmatprep.mubr.msk.f32.mxu0 %vm307_vm0, %v308_v6 }
   0x2   :  { %v261_v4 = vpack.c.bf16 %v25_v1, %v24_v0  ;;  %v27_v5 = vld [vmem:[%s398_s1 + $0x18] sm:$0xff]  ;;  %272 = vmatprep.subr.bf16.mxu1 %v306_v3  ;;  %257 = vmatprep.mubr.msk.f32.mxu1 %vm307_vm0, %v308_v6  ;;  %v113_v8 = vld [vmem:[%s400_s3] sm:$0xff]  ;;  %v114_v9 = vld [vmem:[%s400_s3 + $0x8] sm:$0xff] }
   0x3   :  { %v264_v7 = vpack.c.bf16 %v27_v5, %v26_v2  ;;  %v28_v10 = vld [vmem:[%s398_s1 + $0x20] sm:$0xff]  ;;  %v29_v11 = vld [vmem:[%s398_s1 + $0x28] sm:$0xff]  ;;  %v273_v12 = vpack.c.bf16 %v114_v9, %v113_v8 }
   0x4   :  { %262 = vmatpush3.bf16.msra.mxu0 %v261_v4 }
   0x5   :  { %263 = vmatprep.subr.bf16.mxu0 %v306_v3 }
   0x6   :  { %10 = vsyncpa [#allocation3], 0  ;;  %274 = vmatpush3.bf16.msra.mxu1 %v273_v12  ;;  %v267_v13 = vpack.c.bf16 %v29_v11, %v28_v10  ;;  %v30_v14 = vld [vmem:[%s398_s1 + $0x30] sm:$0xff]  ;;  %v31_v15 = vld [vmem:[%s398_s1 + $0x38] sm:$0xff]  ;;  %vm38_vm1 = vcmask 523264   ;;  %vm123_vm2 = vcmask 261120  }
   0x7   :  { %275 = vmatprep.subr.bf16.mxu1 %v306_v3  ;;  %v270_v16 = vpack.c.bf16 %v31_v15, %v30_v14  ;;  %v23_v17 = vld [vmem:[%s397_s0] sm:$0xff]  ;;  %v115_v18 = vld [vmem:[%s400_s3 + $0x10] sm:$0xff]  ;;  %v116_v19 = vld [vmem:[%s400_s3 + $0x18] sm:$0xff]  ;;  %s309_s21 = smov [#allocation2]  }
   0x8   :  { %265 = vmatpush3.bf16.msra.mxu0 %v264_v7  ;;  %v276_v20 = vpack.c.bf16 %v116_v19, %v115_v18  ;;  %v212_v21 = vld [vmem:[%s399_s2] ss:$0 sm:$0xff]  ;;  %s204_s22 = sshll.u32 %s309_s21, 4  ;;  %s205_s22 = int_to_ptr.vmem [resolvable:$true] %s204_s22 }
   0x9   :  { %266 = vmatprep.subr.bf16.mxu0 %v306_v3  ;;  %v214_v26 = vld [vmem:[%s401_s4] ss:$0 sm:$0xff]  ;;  %s282_s3 = scalar_lea.vmem %s205_s22, 128  ;;  %p287_p1 = scmp.lt.s32.totalorder %s205_s22, %s205_s22 }
   0xa   :  { %277 = vmatpush3.bf16.msra.mxu1 %v276_v20  ;;  %p283_p0 = scmp.ne.s32.totalorder %s205_s22, %s282_s3  ;;  %p288_p2 = scmp.lt.s32.totalorder %s282_s3, %s282_s3 }
   0xc   :  { %268 = vmatpush3.bf16.msra.mxu0 %v267_v13  ;;  %p289_p3 = por %p288_p2, %p287_p1 }
   0xd   :  { %269 = vmatprep.subr.bf16.mxu0 %v306_v3 }
   0xe   :  { %p290_p4 = pnand %p289_p3, %p283_p0 }
  0x10   :  { %271 = vmatpush3.bf16.msra.mxu0 %v270_v16 }
  0x13   :  { %247 = vmatmul.mubr.msk.f32.vlgmr.msra.gmra.mrb[0].mxu0 %vm38_vm1, %v23_v17 }
  0xe6   :  { %v108_v22 = vpop.f32.mrb[0].mxu0 }
  0xe7   :  { %v109_v23 = vadd.f32 %v212_v21, %v108_v22  ;;  %v248_v24 = vpop.f32.mrb[1].mxu0 }
  0xe9   :  { %v112_v25 = vmax.f32 %v109_v23, 0.0 }
  0xeb   :  { %258 = vmatmul.mubr.msk.f32.vlgmr.msra.gmra.mrb[0].mxu1 %vm123_vm2, %v112_v25 }
 0x1be   :  { %v193_v27 = vpop.f32.mrb[0].mxu1 }
 0x1bf   :  { %v194_v28 = vadd.f32 %v214_v26, %v193_v27  ;;  %v259_v29 = vpop.f32.mrb[1].mxu1 }
 0x1c1   :  { %197 = vst.msk [vmem:[#allocation2] sm:$0xff] %vm123_vm2, %v194_v28 }
 0x1c2   :  { %293 = shalt.err (!%p290_p4)
}
 0x1c3   :  { %s294_s24 = scalar_lea.hbm %s402_s5, 128 }
 0x1c4   :  { %p295_p5 = scmp.ne.s32.totalorder %s402_s5, %s294_s24  ;;  %p298_p6 = scmp.lt.u32.totalorder %s294_s24, %s402_s5 }
 0x1c6   :  { %p300_p7 = pnand %p298_p6, %p295_p5 }
 0x1c8   :  { %303 = shalt.err (!%p300_p7)
}
 0x1c9   :  { %207 = dma.vmem_to_hbm [thread:$0]  %s205_s22, 128, %s402_s5, [#allocation3]  }
 0x1ca   :  { %304 = dma.done.wait [#allocation3], 128  }
 0x1cb   :  { %305 = vsyncadd [#allocation3], 4294967168 }
 0x1cc   :  { %211 = vsyncpa [#allocation3], 1 }

</bundles_post_ra>
